<compile_context>
chip_gen: v7x
topology: tpu7x:2x2x1
jax: 0.10.0
libtpu: 0.0.40
codegen_flags: <defaults>
</compile_context>

<pallas_src>
import functools
import math

import jax
import jax.numpy as jnp
from jax.experimental import pallas as pl
from jax.experimental.pallas import tpu as pltpu


def _cdiv(a, b):
    return -(-a // b)


def _vmem_budget_bytes():
    """Scoped-VMEM budget, safe per TPU generation (per TensorCore)."""
    try:
        kind = jax.devices()[0].device_kind.lower()
    except Exception:
        kind = ""
    if ("v2" in kind) or ("v3" in kind):
        return 12 * 1024 * 1024          # 16 MiB VMEM / core
    if ("7x" in kind) or ("v7" in kind):
        return 48 * 1024 * 1024          # 64 MiB VMEM / TensorCore
    if ("v4" in kind) or ("v5" in kind) or ("v6" in kind):
        return 96 * 1024 * 1024          # 128 MiB VMEM / TensorCore
    return 48 * 1024 * 1024              # unknown chip: assume small VMEM


def _num_tensorcores():
    """TensorCores one pallas_call can shard a 'parallel' axis across."""
    try:
        kind = jax.devices()[0].device_kind.lower()
    except Exception:
        return 1
    if ("v4" in kind) or ("v5p" in kind) or ("v7" in kind) or ("7x" in kind):
        return 2                          # megacore / dual-TC chips
    return 1                              # v5e / v6e: single TensorCore


def _choose_tile_rows(m_rows, width, itemsize, sublane, target_bytes):
    """Largest row tile within target_bytes, dtype-native sublane aligned."""
    rows = max(sublane, target_bytes // max(1, width * itemsize))
    rows = max(sublane, (rows // sublane) * sublane)
    if rows >= m_rows:
        return m_rows     # single block == full array: always a legal shape
    return rows


# ----------------------------- Pallas kernels ------------------------------

def _fused_kernel(x_ref, gamma_ref, beta_ref, o_ref, *, k, c, m_total, eps):
    """Whole-array (VMEM-resident) BN: mean, centered var, scale/shift."""
    width = k * c
    x = x_ref[...].astype(jnp.float32)                    # (rows, width)

    def fold(v):
        # Cyclic butterfly over the k packed lane-groups (k is a power of
        # two): afterwards every lane holds the total of its own channel.
        s = c
        while s < width:
            v = v + pltpu.roll(v, shift=s, axis=1)
            s *= 2
        return v

    inv_m = 1.0 / float(m_total)
    mean = fold(jnp.sum(x, axis=0, keepdims=True)) * inv_m
    xc = x - mean
    var = fold(jnp.sum(xc * xc, axis=0, keepdims=True)) * inv_m
    inv_std = jax.lax.rsqrt(var + jnp.float32(eps))
    scale = gamma_ref[...] * inv_std
    shift = beta_ref[...] - mean * scale
    o_ref[...] = (x * scale + shift).astype(o_ref.dtype)


def _stats_kernel(x_ref, shift_ref, sum_ref, sq_ref, *, tile_rows, m_rows,
                  tiles_per_part, any_partial):
    """Per-lane sum / shifted sum-of-squares partials for one grid part."""
    p = pl.program_id(0)
    i = pl.program_id(1)

    @pl.when(i == 0)
    def _():
        sum_ref[...] = jnp.zeros_like(sum_ref)
        sq_ref[...] = jnp.zeros_like(sq_ref)

    x = x_ref[...].astype(jnp.float32)
    xs = x - shift_ref[...]          # shifted for numerically stable variance

    def accumulate(xv, xsv):
        sum_ref[...] += jnp.sum(xv, axis=0)[None, None, :]
        sq_ref[...] += jnp.sum(xsv * xsv, axis=0)[None, None, :]

    if any_partial:
        row_start = (p * tiles_per_part + i) * tile_rows
        is_partial = row_start + tile_rows > m_rows

        @pl.when(is_partial)
        def _():
            # Ragged last tile or fully-masked duplicated tile of the split.
            rows = jax.lax.broadcasted_iota(jnp.int32, x.shape, 0) + row_start
            valid = rows < m_rows
            accumulate(jnp.where(valid, x, 0.0), jnp.where(valid, xs, 0.0))

        @pl.when(jnp.logical_not(is_partial))
        def _():
            accumulate(x, xs)        # unmasked fast path for full tiles
    else:
        accumulate(x, xs)


def _normalize_kernel(x_ref, scale_ref, shift_ref, o_ref):
    """Fused y = x * scale + shift (scale/shift precomputed per channel)."""
    x = x_ref[...].astype(jnp.float32)
    o_ref[...] = (x * scale_ref[...] + shift_ref[...]).astype(o_ref.dtype)


# ------------------------------ Python wrapper ------------------------------

def point_batch_norm(x, gamma, beta, *, eps=1e-5, num_parts=None):
    """Training-mode BatchNorm1d over the channel axis of ([B], N, C) input."""
    orig_shape = x.shape
    if x.ndim == 3:
        b, n, c = x.shape
        x2 = x.reshape(b * n, c)
    elif x.ndim == 2:
        x2 = x
        c = x.shape[-1]
    else:
        raise NotImplementedError("PointBatchNorm expects ([B], N, C) input")
    m = x2.shape[0]

    itemsize = jnp.dtype(x.dtype).itemsize
    sublane = max(8, 32 // max(1, itemsize))     # 8 f32 / 16 bf16 / 32 int8

    vmem_budget = _vmem_budget_bytes()
    fused_max_f32_bytes = vmem_budget // 6
    tile_target = min(8 << 20, max(1 << 20, vmem_budget // 6))

    # ---- lane packing: make the last dim a multiple of 128 when possible ----
    k = 1
    if c % 128 != 0:
        kk = 128 // math.gcd(c, 128)
        if kk > 1 and kk * c <= 2048 and m >= kk:
            k = kk
    width = k * c
    m_main = (m // k) * k
    rem = m - m_main
    m_rows = m_main // k
    x_main = x2[:m_main].reshape(m_rows, width) if k > 1 else x2

    gamma_c = gamma.astype(jnp.float32).reshape(-1)
    beta_c = beta.astype(jnp.float32).reshape(-1)

    # ---- fused single-kernel path: x stays VMEM-resident (1 read + 1 write) --
    if rem == 0 and m_rows * width * 4 <= fused_max_f32_bytes:
        gamma_w = jnp.tile(gamma_c, k).reshape(1, width)
        beta_w = jnp.tile(beta_c, k).reshape(1, width)
        full_spec = pl.BlockSpec((m_rows, width), lambda i: (0, 0))
        chan_spec = pl.BlockSpec((1, width), lambda i: (0, 0))
        out = pl.pallas_call(
            functools.partial(_fused_kernel, k=k, c=c, m_total=m, eps=eps),
            out_shape=jax.ShapeDtypeStruct((m_rows, width), x.dtype),
            grid_spec=pltpu.PrefetchScalarGridSpec(
                num_scalar_prefetch=0,
                grid=(1,),
                in_specs=[full_spec, chan_spec, chan_spec],
                out_specs=full_spec),
            compiler_params=pltpu.CompilerParams(
                dimension_semantics=("arbitrary",),
                vmem_limit_bytes=vmem_budget),
        )(x_main, gamma_w, beta_w)
        return out.reshape(orig_shape)

    # -------------------------- two-pass fallback ----------------------------
    tile_rows = _choose_tile_rows(m_rows, width, itemsize, sublane, tile_target)
    n_tiles = _cdiv(m_rows, tile_rows)

    if num_parts is None:
        num_parts = _num_tensorcores()
    num_parts = max(1, min(int(num_parts), n_tiles))
    tiles_per_part = _cdiv(n_tiles, num_parts)
    any_partial = (num_parts * tiles_per_part * tile_rows != m_rows)

    last_tile = n_tiles - 1
    if num_parts * tiles_per_part > n_tiles:
        # Clamp to a valid block; the duplicated tile is fully masked in-kernel.
        def x_stats_map(p, i):
            return (jnp.minimum(p * tiles_per_part + i, last_tile), 0)
    else:
        def x_stats_map(p, i):
            return (p * tiles_per_part + i, 0)

    # Shift for numerically stable (shifted) variance: the first point.
    shift_c = x2[0].astype(jnp.float32)
    shift_stats_w = jnp.tile(shift_c, k).reshape(1, width)

    part_spec = pl.BlockSpec((1, 1, width), lambda p, i: (p, 0, 0))
    chan2_spec = pl.BlockSpec((1, width), lambda p, i: (0, 0))

    sums, sqs = pl.pallas_call(
        functools.partial(_stats_kernel, tile_rows=tile_rows, m_rows=m_rows,
                          tiles_per_part=tiles_per_part,
                          any_partial=any_partial),
        out_shape=(jax.ShapeDtypeStruct((num_parts, 1, width), jnp.float32),
                   jax.ShapeDtypeStruct((num_parts, 1, width), jnp.float32)),
        grid_spec=pltpu.PrefetchScalarGridSpec(
            num_scalar_prefetch=0,
            grid=(num_parts, tiles_per_part),
            in_specs=[pl.BlockSpec((tile_rows, width), x_stats_map),
                      chan2_spec],
            out_specs=[part_spec, part_spec]),
        compiler_params=pltpu.CompilerParams(
            dimension_semantics=("parallel", "arbitrary"),
            vmem_limit_bytes=vmem_budget),
    )(x_main, shift_stats_w)

    # ---- tiny O(C) glue: fold parts / lane groups, remainder, scale & shift --
    sum_c = sums.reshape(-1, k, c).sum(axis=(0, 1))
    sq_c = sqs.reshape(-1, k, c).sum(axis=(0, 1))
    if rem > 0:
        xr = x2[m_main:].astype(jnp.float32)
        sum_c = sum_c + xr.sum(axis=0)
        dr = xr - shift_c
        sq_c = sq_c + (dr * dr).sum(axis=0)

    cnt = jnp.float32(m)
    mean = sum_c / cnt
    d = mean - shift_c
    var = jnp.maximum(sq_c / cnt - d * d, 0.0)     # biased variance
    inv_std = jax.lax.rsqrt(var + jnp.float32(eps))
    scale = gamma_c * inv_std
    shift = beta_c - mean * scale
    scale_w = jnp.tile(scale, k).reshape(1, width)
    shift_w = jnp.tile(shift, k).reshape(1, width)

    # ---- pass 2: y = x * scale + shift, fully parallel over row tiles -------
    row_spec = pl.BlockSpec((tile_rows, width), lambda i: (i, 0))
    chan_spec = pl.BlockSpec((1, width), lambda i: (0, 0))

    out_main = pl.pallas_call(
        _normalize_kernel,
        out_shape=jax.ShapeDtypeStruct((m_rows, width), x.dtype),
        grid_spec=pltpu.PrefetchScalarGridSpec(
            num_scalar_prefetch=0,
            grid=(n_tiles,),
            in_specs=[row_spec, chan_spec, chan_spec],
            out_specs=row_spec),
        compiler_params=pltpu.CompilerParams(
            dimension_semantics=("parallel",),
            vmem_limit_bytes=vmem_budget),
    )(x_main, scale_w, shift_w)

    if rem > 0:
        out_rem = (x2[m_main:].astype(jnp.float32) * scale + shift
                   ).astype(x.dtype)
        out2 = jnp.concatenate([out_main.reshape(m_main, c), out_rem], axis=0)
        return out2.reshape(orig_shape)
    return out_main.reshape(orig_shape)


# ------------------------------ reference impl ------------------------------

def point_batch_norm_ref(x, gamma, beta, eps=1e-5):
    if x.ndim == 3:
        b, n, c = x.shape
        x2 = x.reshape(b * n, c).astype(jnp.float32)
    else:
        x2 = x.astype(jnp.float32)
    mean = x2.mean(axis=0)
    var = x2.var(axis=0)   # biased, as PyTorch uses for normalization
    y = (x2 - mean) * jax.lax.rsqrt(var + eps) * gamma + beta
    return y.reshape(x.shape).astype(x.dtype)


# ----------------------------------- main -----------------------------------

if __name__ == "__main__":
    key = jax.random.PRNGKey(0)
    k1, k2, k3, k4, k5, kg, kb, kg2, kb2 = jax.random.split(key, 9)

    C = 32
    # nn.BatchNorm1d(embed_channels): weight (C,), bias (C,), non-trivial init.
    gamma = 1.0 + 0.1 * jax.random.normal(kg, (C,), dtype=jnp.float32)
    beta = 0.1 * jax.random.normal(kb, (C,), dtype=jnp.float32)

    # Small ([B], N, C) inputs -> fused VMEM-resident single-kernel path.
    x3d = jax.random.normal(k1, (2, 16, C), dtype=jnp.float32)
    x2d = jax.random.normal(k2, (16, C), dtype=jnp.float32)
    # Large enough to exceed the fused VMEM budget on every generation ->
    # two-pass tiled path with a ragged (masked) last tile.
    xlg = jax.random.normal(k3, (200000, C), dtype=jnp.float32)
    # Row count not divisible by the packing factor -> packed bulk + remainder.
    xrem = jax.random.normal(k4, (1001, C), dtype=jnp.float32)
    # Channel count that cannot be lane-packed -> lane-sparse fallback.
    C2 = 100
    gamma2 = 1.0 + 0.1 * jax.random.normal(kg2, (C2,), dtype=jnp.float32)
    beta2 = 0.1 * jax.random.normal(kb2, (C2,), dtype=jnp.float32)
    xodd = jax.random.normal(k5, (64, C2), dtype=jnp.float32)

    cases = [
        (x3d, gamma, beta, {}),
        (x2d, gamma, beta, {}),
        (xlg, gamma, beta, {}),
        (xlg, gamma, beta, {"num_parts": 3}),   # forced multi-part stats grid
        (xrem, gamma, beta, {}),
        (xodd, gamma2, beta2, {}),
    ]
    for xi, gi, bi, kw in cases:
        out = jax.block_until_ready(point_batch_norm(xi, gi, bi, **kw))
        ref = point_batch_norm_ref(xi, gi, bi)
        assert out.shape == xi.shape and out.dtype == xi.dtype, (xi.shape, kw)
        assert jnp.allclose(out, ref, atol=1e-4, rtol=1e-5), (xi.shape, kw)

    print("KERNEL_OK")
</pallas_src>

<mosaic_0001>
module attributes {stable_mosaic.version = 11 : i64} {
  func.func @_fused_kernel(%arg0: i32, %arg1: memref<8x128xf32, #tpu.memory_space<vmem>>, %arg2: memref<1x128xf32, #tpu.memory_space<vmem>>, %arg3: memref<1x128xf32, #tpu.memory_space<vmem>>, %arg4: memref<8x128xf32, #tpu.memory_space<vmem>>) attributes {dimension_semantics = [#tpu.dimension_semantics<arbitrary>], iteration_bounds = array<i64: 1>, scalar_prefetch = 0 : i64, scratch_operands = 0 : i64, tpu.core_type = #tpu.core_type<tc>, window_params = [{pipeline_mode = #tpu.pipeline_mode<synchronous>, transform_indices = @transform_0, window_bounds = array<i64: 8, 128>}, {pipeline_mode = #tpu.pipeline_mode<synchronous>, transform_indices = @transform_1, window_bounds = array<i64: 1, 128>}, {pipeline_mode = #tpu.pipeline_mode<synchronous>, transform_indices = @transform_2, window_bounds = array<i64: 1, 128>}, {pipeline_mode = #tpu.pipeline_mode<synchronous>, transform_indices = @transform_3, window_bounds = array<i64: 8, 128>}]} {
    %c0 = arith.constant 0 : index
    %c0_0 = arith.constant 0 : index
    %0 = vector.load %arg1[%c0, %c0_0] : memref<8x128xf32, #tpu.memory_space<vmem>>, vector<8x128xf32>
    %cst = arith.constant dense<0.000000e+00> : vector<128xf32>
    %1 = vector.multi_reduction <add>, %0, %cst [0] : vector<8x128xf32> to vector<128xf32>
    %2 = vector.shape_cast %1 : vector<128xf32> to vector<1x128xf32>
    %c32_i32 = arith.constant 32 : i32
    %3 = tpu.dynamic_rotate %2 by %c32_i32 dim 1 : vector<1x128xf32>, i32 -> vector<1x128xf32>
    %4 = arith.addf %2, %3 : vector<1x128xf32>
    %c64_i32 = arith.constant 64 : i32
    %5 = tpu.dynamic_rotate %4 by %c64_i32 dim 1 : vector<1x128xf32>, i32 -> vector<1x128xf32>
    %6 = arith.addf %4, %5 : vector<1x128xf32>
    %cst_1 = arith.constant 3.125000e-02 : f32
    %7 = vector.broadcast %cst_1 : f32 to vector<1x128xf32>
    %8 = arith.mulf %6, %7 : vector<1x128xf32>
    %9 = vector.broadcast %8 : vector<1x128xf32> to vector<8x128xf32>
    %10 = arith.subf %0, %9 : vector<8x128xf32>
    %11 = arith.mulf %10, %10 : vector<8x128xf32>
    %cst_2 = arith.constant dense<0.000000e+00> : vector<128xf32>
    %12 = vector.multi_reduction <add>, %11, %cst_2 [0] : vector<8x128xf32> to vector<128xf32>
    %13 = vector.shape_cast %12 : vector<128xf32> to vector<1x128xf32>
    %c32_i32_3 = arith.constant 32 : i32
    %14 = tpu.dynamic_rotate %13 by %c32_i32_3 dim 1 : vector<1x128xf32>, i32 -> vector<1x128xf32>
    %15 = arith.addf %13, %14 : vector<1x128xf32>
    %c64_i32_4 = arith.constant 64 : i32
    %16 = tpu.dynamic_rotate %15 by %c64_i32_4 dim 1 : vector<1x128xf32>, i32 -> vector<1x128xf32>
    %17 = arith.addf %15, %16 : vector<1x128xf32>
    %cst_5 = arith.constant 3.125000e-02 : f32
    %18 = vector.broadcast %cst_5 : f32 to vector<1x128xf32>
    %19 = arith.mulf %17, %18 : vector<1x128xf32>
    %cst_6 = arith.constant 9.99999974E-6 : f32
    %20 = vector.broadcast %cst_6 : f32 to vector<1x128xf32>
    %21 = arith.addf %19, %20 : vector<1x128xf32>
    %22 = math.rsqrt %21 : vector<1x128xf32>
    %c0_7 = arith.constant 0 : index
    %c0_8 = arith.constant 0 : index
    %23 = vector.load %arg2[%c0_7, %c0_8] : memref<1x128xf32, #tpu.memory_space<vmem>>, vector<1x128xf32>
    %24 = arith.mulf %23, %22 : vector<1x128xf32>
    %c0_9 = arith.constant 0 : index
    %c0_10 = arith.constant 0 : index
    %25 = vector.load %arg3[%c0_9, %c0_10] : memref<1x128xf32, #tpu.memory_space<vmem>>, vector<1x128xf32>
    %26 = arith.mulf %8, %24 : vector<1x128xf32>
    %27 = arith.subf %25, %26 : vector<1x128xf32>
    %28 = vector.broadcast %24 : vector<1x128xf32> to vector<8x128xf32>
    %29 = arith.mulf %0, %28 : vector<8x128xf32>
    %30 = vector.broadcast %27 : vector<1x128xf32> to vector<8x128xf32>
    %31 = arith.addf %29, %30 : vector<8x128xf32>
    %c0_11 = arith.constant 0 : index
    %c0_12 = arith.constant 0 : index
    %32 = vector.load %arg4[%c0_11, %c0_12] : memref<8x128xf32, #tpu.memory_space<vmem>>, vector<8x128xf32>
    tpu.vector_store %arg4[%c0_11, %c0_12], %31 {strides = array<i32>} : memref<8x128xf32, #tpu.memory_space<vmem>>, vector<8x128xf32>,
    return
  }
  func.func @transform_0(%arg0: i32) -> (i32, i32) {
    %c0_i32 = arith.constant 0 : i32
    %c0_i32_0 = arith.constant 0 : i32
    %c0_i32_1 = arith.constant 0 : i32
    return %c0_i32, %c0_i32_0 : i32, i32
  }
  func.func @transform_1(%arg0: i32) -> (i32, i32) {
    %c0_i32 = arith.constant 0 : i32
    %c0_i32_0 = arith.constant 0 : i32
    %c0_i32_1 = arith.constant 0 : i32
    return %c0_i32, %c0_i32_0 : i32, i32
  }
  func.func @transform_2(%arg0: i32) -> (i32, i32) {
    %c0_i32 = arith.constant 0 : i32
    %c0_i32_0 = arith.constant 0 : i32
    %c0_i32_1 = arith.constant 0 : i32
    return %c0_i32, %c0_i32_0 : i32, i32
  }
  func.func @transform_3(%arg0: i32) -> (i32, i32) {
    %c0_i32 = arith.constant 0 : i32
    %c0_i32_0 = arith.constant 0 : i32
    %c0_i32_1 = arith.constant 0 : i32
    return %c0_i32, %c0_i32_0 : i32, i32
  }
}

</mosaic_0001>

<bundles_post_ra>
// kernel: tpu_custom_call.1
= control target key start
LH: loop header
LB: loop body
LE: loop exit
PB: predicated region body
PF: predicated region fallthrough
CT: control target
= control target key end

     0   :  { %8 = vsyncpa [#allocation3], 0  ;;  %s205_s0 = inlined_call_operand.hbm [shape: f32[8,128], index: 0, kind: input, shape index: {}]   ;;  %s206_s1 = inlined_call_operand.vmem [shape: f32[1,128], index: 1, kind: input, shape index: {}]   ;;  %s207_s2 = inlined_call_operand.vmem [shape: f32[1,128], index: 2, kind: input, shape index: {}]   ;;  %s208_s3 = inlined_call_operand.hbm [shape: f32[8,128], index: 3, kind: output, shape index: {}]  }
   0x1   :  { %9 = vsyncpa [#allocation4], 0  ;;  %s151_s12 = smov [#allocation2]   ;;  %s103_s16 = scalar_lea.hbm %s205_s0, 128 }
   0x2   :  { %s16_s13 = sshll.u32 %s151_s12, 4  ;;  %p104_p0 = scmp.ne.s32.totalorder %s205_s0, %s103_s16  ;;  %s17_s13 = int_to_ptr.vmem [resolvable:$true] %s16_s13 }
   0x3   :  { %p107_p1 = scmp.lt.u32.totalorder %s103_s16, %s205_s0 }
   0x5   :  { %p109_p2 = pnand %p107_p1, %p104_p0 }
   0x7   :  { %112 = shalt.err (!%p109_p2)
}
   0x8   :  { %s113_s21 = scalar_lea.vmem %s17_s13, 128  ;;  %p118_p4 = scmp.lt.s32.totalorder %s17_s13, %s17_s13 }
   0x9   :  { %p114_p3 = scmp.ne.s32.totalorder %s17_s13, %s113_s21  ;;  %p119_p5 = scmp.lt.s32.totalorder %s113_s21, %s113_s21 }
   0xb   :  { %p120_p6 = por %p119_p5, %p118_p4 }
   0xd   :  { %p121_p7 = pnand %p120_p6, %p114_p3 }
   0xf   :  { %124 = shalt.err (!%p121_p7)
}
  0x10   :  { %19 = dma.hbm_to_vmem [thread:$0]  %s205_s0, 128, %s17_s13, [#allocation3]  }
  0x11   :  { %147 = dma.done.wait [#allocation3], 128  }
  0x12   :  { %148 = vsyncadd [#allocation3], 4294967168  ;;  %v27_v0 = vld [vmem:[#allocation2] sm:$0xff]  ;;  %s152_s24 = smov 32   ;;  %s153_s25 = smov 64   ;;  %v41_v9 = vlaneseq }
  0x13   :  { %v28_v1 = vrot.slane %v27_v0, 4  ;;  %v62_v30 = vld [vmem:[%s206_s1] sm:$0x1]  ;;  %s154_s29 = smov [#allocation5]  }
  0x14   :  { %v42_v10 = vshrl.u32 %v41_v9, 7  ;;  %v64_v33 = vld [vmem:[%s207_s2] sm:$0x1]  ;;  %s88_s30 = sshll.u32 %s154_s29, 4  ;;  %s89_s30 = int_to_ptr.vmem [resolvable:$true] %s88_s30 }
  0x15   :  { %v29_v2 = vadd.f32 %v28_v1, %v27_v0  ;;  %s125_s4 = scalar_lea.vmem %s89_s30, 128  ;;  %p130_p9 = scmp.lt.s32.totalorder %s89_s30, %s89_s30 }
  0x16   :  { %v43_v12 = vsub.s32 0, %v42_v10  ;;  %p126_p8 = scmp.ne.s32.totalorder %s89_s30, %s125_s4  ;;  %p131_p10 = scmp.lt.s32.totalorder %s125_s4, %s125_s4 }
  0x17   :  { %v30_v3 = vrot.slane %v29_v2, 2 }
  0x18   :  { %p132_p11 = por %p131_p10, %p130_p9 }
  0x19   :  { %v31_v4 = vadd.f32 %v30_v3, %v29_v2 }
  0x1a   :  { %p133_p12 = pnand %p132_p11, %p126_p8 }
  0x1b   :  { %v32_v5 = vrot.slane %v31_v4, 1 }
  0x1d   :  { %v33_v6 = vadd.f32 %v32_v5, %v31_v4 }
  0x1f   :  { %34 = vrot.lane.b32.xlu0 %v33_v6, %s152_s24 }
  0x91   :  { %v35_v7 = vpop.permute.xlu0 %34 }
  0x92   :  { %v36_v8 = vadd.f32 %v35_v7, %v33_v6 }
  0x94   :  { %37 = vrot.lane.b32.xlu0 %v36_v8, %s153_s25 }
 0x106   :  { %v38_v11 = vpop.permute.xlu0 %37 }
 0x107   :  { %v39_v13 = vadd.f32 %v38_v11, %v36_v8 }
 0x109   :  { %v40_v14 = vmul.f32 0.03125, %v39_v13 }
 0x10b   :  { %v44_v15 = vrot.slane %v40_v14, %v43_v12 }
 0x10d   :  { %v45_v16 = vsub.f32 %v27_v0, %v44_v15 }
 0x10f   :  { %v46_v17 = vmul.f32 %v45_v16, %v45_v16 }
 0x111   :  { %v47_v18 = vrot.slane %v46_v17, 4 }
 0x113   :  { %v48_v19 = vadd.f32 %v47_v18, %v46_v17 }
 0x115   :  { %v49_v20 = vrot.slane %v48_v19, 2 }
 0x117   :  { %v50_v21 = vadd.f32 %v49_v20, %v48_v19 }
 0x119   :  { %v51_v22 = vrot.slane %v50_v21, 1 }
 0x11b   :  { %v52_v23 = vadd.f32 %v51_v22, %v50_v21 }
 0x11d   :  { %53 = vrot.lane.b32.xlu1 %v52_v23, %s152_s24 }
 0x18f   :  { %v54_v24 = vpop.permute.xlu1 %53 }
 0x190   :  { %v55_v25 = vadd.f32 %v54_v24, %v52_v23 }
 0x192   :  { %56 = vrot.lane.b32.xlu1 %v55_v25, %s153_s25 }
 0x204   :  { %v57_v26 = vpop.permute.xlu1 %56 }
 0x205   :  { %v58_v27 = vadd.f32 %v57_v26, %v55_v25 }
 0x207   :  { %v59_v28 = vmul.f32 0.03125, %v58_v27 }
 0x209   :  { %v60_v29 = vadd.f32 1e-05, %v59_v28 }
 0x20b   :  { %101 = vrsqrt.f32 %v60_v29 }
 0x215   :  { %v102_v31 = vpop.eup %101 }
 0x216   :  { %v63_v32 = vmul.f32 %v102_v31, %v62_v30 }
 0x218   :  { %v65_v34 = vmul.f32 %v63_v32, %v40_v14  ;;  %v71_v35 = vrot.slane %v63_v32, %v43_v12 }
 0x21a   :  { %v66_v36 = vsub.f32 %v64_v33, %v65_v34  ;;  %v73_v37 = vmul.f32 %v71_v35, %v27_v0 }
 0x21c   :  { %v78_v38 = vrot.slane %v66_v36, %v43_v12 }
 0x21e   :  { %v80_v39 = vadd.f32 %v78_v38, %v73_v37 }
 0x220   :  { %81 = vst [vmem:[#allocation5] sm:$0xff] %v80_v39 }
 0x221   :  { %136 = shalt.err (!%p133_p12)
}
 0x222   :  { %s137_s2 = scalar_lea.hbm %s208_s3, 128 }
 0x223   :  { %p138_p13 = scmp.ne.s32.totalorder %s208_s3, %s137_s2  ;;  %p141_p0 = scmp.lt.u32.totalorder %s137_s2, %s208_s3 }
 0x225   :  { %p143_p1 = pnand %p141_p0, %p138_p13 }
 0x227   :  { %146 = shalt.err (!%p143_p1)
}
 0x228   :  { %91 = dma.vmem_to_hbm [thread:$0]  %s89_s30, 128, %s208_s3, [#allocation4]  }
 0x229   :  { %149 = dma.done.wait [#allocation4], 128  }
 0x22a   :  { %150 = vsyncadd [#allocation4], 4294967168 }
 0x22b   :  { %95 = vsyncpa [#allocation3], 1 }
 0x22c   :  { %96 = vsyncpa [#allocation4], 1 }

</bundles_post_ra>
